<compile_context>
chip_gen: v7x
topology: tpu7x:2x2x1
jax: 0.10.0
libtpu: 0.0.40
codegen_flags: <defaults>
</compile_context>

<pallas_src>
import jax
import jax.numpy as jnp
from jax.experimental import pallas as pl
from jax.experimental.pallas import tpu as pltpu


_LANES = 128
_FAST_PATH_ELEMS = 65536          # below this, plain XLA clip beats a pallas_call


def _relu6_kernel(x_ref, o_ref):
    # Elementwise clamp to [0, 6] on the whole VMEM tile (VPU work only).
    x = x_ref[...]
    zero = jnp.array(0, x.dtype)
    six = jnp.array(6, x.dtype)
    o_ref[...] = jnp.minimum(jnp.maximum(x, zero), six)


def _sublane_multiple(dtype):
    # Sub-32-bit dtypes pack along sublanes: bf16 -> 16 rows, int8/fp8 -> 32 rows.
    itemsize = jnp.dtype(dtype).itemsize
    return {4: 8, 2: 16, 1: 32}.get(itemsize, 8)


def _round_up(a, b):
    return -(-a // b) * b


def _chip_params():
    """Per-generation (block_bytes, vmem_limit_bytes, min_grid_programs).

    block_bytes is the per-tile budget; with double-buffered input + output the
    scoped-VMEM use is ~4x that, which each vmem_limit below comfortably covers
    while staying under the chip's physical VMEM (64 MiB/TC on v7x, 128 MiB on
    v5e/v6e).  min_grid_programs > 1 only on the 2-TC chip so each core keeps
    several pipelined steps.
    """
    kind = ""
    try:
        kind = jax.devices()[0].device_kind.lower()
    except Exception:
        pass
    if "v7" in kind:
        # 2 TCs, 64 MiB VMEM/TC, ~3.2 TB/s per TC: bigger blocks, >= 8 grid steps.
        return 6 * 1024 * 1024, 40 * 1024 * 1024, 8
    if "v6" in kind:
        # 1 TC, 128 MiB VMEM, ~1.4 TB/s: large blocks, plenty of VMEM headroom.
        return 8 * 1024 * 1024, 48 * 1024 * 1024, 1
    if "v5e" in kind or "v5 lite" in kind or "v5lite" in kind:
        # 1 TC, ~0.82 TB/s: 2 MiB blocks are already ~93% step-efficient.
        return 2 * 1024 * 1024, 16 * 1024 * 1024, 1
    # Unknown chip: conservative block, leave the scoped-VMEM limit at default.
    return 2 * 1024 * 1024, None, 1


def _run_2d(x2d, block_bytes, vmem_limit, min_programs):
    """Run the clamp kernel over a (rows, width) lane-dense slab."""
    rows, width = x2d.shape
    dtype = x2d.dtype
    sublane = _sublane_multiple(dtype)
    itemsize = jnp.dtype(dtype).itemsize

    if rows <= sublane:
        # Full-dim row block is always legal (covers tiny / 1-row views).
        tile_rows = rows
    else:
        # Budget-sized tile (multiple of the sublane granularity).
        tile_rows = max(
            sublane,
            (block_bytes // max(1, width * itemsize)) // sublane * sublane,
        )
        if min_programs > 1:
            # v7x: ensure >= min_programs grid steps so both TensorCores get
            # several pipelined iterations (DMA/compute overlap per core).
            per_prog = _round_up(pl.cdiv(rows, min_programs), sublane)
            tile_rows = min(tile_rows, max(sublane, per_prog))
        # Never request a block taller than the (sublane-padded) row extent.
        tile_rows = min(tile_rows, _round_up(rows, sublane))

    grid = (pl.cdiv(rows, tile_rows),)  # partial last block is masked by Pallas

    return pl.pallas_call(
        _relu6_kernel,
        out_shape=jax.ShapeDtypeStruct((rows, width), dtype),
        grid_spec=pltpu.PrefetchScalarGridSpec(
            num_scalar_prefetch=0,
            grid=grid,
            in_specs=[pl.BlockSpec((tile_rows, width), lambda i: (i, 0))],
            out_specs=pl.BlockSpec((tile_rows, width), lambda i: (i, 0)),
        ),
        compiler_params=pltpu.CompilerParams(
            dimension_semantics=("parallel",),
            vmem_limit_bytes=vmem_limit,
        ),
    )(x2d)


def relu6(x):
    """clamp(x, 0, 6) — forward of SelfDefinedRelu. Works for any shape/dtype."""
    orig_shape = x.shape
    n = x.size
    if n == 0:
        return x
    if n < _FAST_PATH_ELEMS:
        # Pallas launch + pipeline prologue dwarfs the work for tiny tensors.
        return jnp.clip(x, 0, 6)

    block_bytes, vmem_limit, min_programs = _chip_params()
    flat = jnp.ravel(x)

    # Happy path: widest lane-dense slab width that divides the element count
    # -> no padding, no masked lanes.
    for w in (2048, 1024, 512, 256, 128):
        if n % w == 0:
            out2d = _run_2d(flat.reshape(n // w, w),
                            block_bytes, vmem_limit, min_programs)
            return out2d.reshape(orig_shape)

    # Ragged path (element count not a multiple of 128): build a free 2-D view
    # from the trailing dims.  The BlockSpec lane dim equals the full width,
    # which is legal for non-128-multiples; Pallas masks the partial lanes.
    itemsize = jnp.dtype(x.dtype).itemsize
    sublane = _sublane_multiple(x.dtype)
    width = 1
    for d in reversed(orig_shape):
        if width >= _LANES:
            break
        width *= d
    rows = n // width
    # Only take this path if a minimum-height block still fits the budget.
    if min(rows, sublane) * width * itemsize <= block_bytes:
        out2d = _run_2d(flat.reshape(rows, width),
                        block_bytes, vmem_limit, min_programs)
        return out2d.reshape(orig_shape)

    # Last resort (degenerate shapes, e.g. huge ragged 1-D arrays):
    # pad once, run, slice.
    width = _LANES
    rows = -(-n // width)
    padded = jnp.pad(flat, (0, rows * width - n))
    out2d = _run_2d(padded.reshape(rows, width),
                    block_bytes, vmem_limit, min_programs)
    return out2d.reshape(-1)[:n].reshape(orig_shape)


class ReluPallas:
    """JAX/Pallas equivalent of the PyTorch `Relu` module (no parameters)."""

    def __call__(self, x):
        return relu6(x)


if __name__ == "__main__":
    key = jax.random.PRNGKey(0)
    k1, k2, k3 = jax.random.split(key, 3)
    model = ReluPallas()

    # Small NCHW input matching the PyTorch module usage (XLA fast path).
    x = jax.random.normal(k1, (2, 4, 16, 16), dtype=jnp.float32) * 5.0
    out = jax.block_until_ready(model(x))
    assert out.shape == x.shape and out.dtype == x.dtype
    assert jnp.array_equal(out, jnp.clip(x, 0.0, 6.0))

    # Larger activation that exercises the Pallas kernel path (lane-dense, no pad).
    x_big = jax.random.normal(k2, (2, 16, 64, 64), dtype=jnp.float32) * 5.0
    out_big = jax.block_until_ready(model(x_big))
    assert jnp.array_equal(out_big, jnp.clip(x_big, 0.0, 6.0))

    # bf16 input (16-row sublane granularity) through the kernel path.
    x_bf16 = (jax.random.normal(k3, (2, 16, 64, 64), dtype=jnp.float32) * 5.0
              ).astype(jnp.bfloat16)
    out_bf16 = jax.block_until_ready(model(x_bf16))
    assert out_bf16.dtype == jnp.bfloat16
    assert jnp.array_equal(out_bf16, jnp.clip(x_bf16, 0, 6))

    # Ragged element count (not a multiple of 128) -> masked-lane 2-D view path
    # (no pad + slice HBM passes).
    x_rag = jax.random.normal(k1, (3, 7, 61, 67), dtype=jnp.float32) * 5.0
    out_rag = jax.block_until_ready(model(x_rag))
    assert out_rag.shape == x_rag.shape
    assert jnp.array_equal(out_rag, jnp.clip(x_rag, 0.0, 6.0))

    print("KERNEL_OK")
</pallas_src>

<mosaic_0001>
module attributes {stable_mosaic.version = 11 : i64} {
  func.func @_relu6_kernel(%arg0: i32, %arg1: memref<64x2048xf32, #tpu.memory_space<vmem>>, %arg2: memref<64x2048xf32, #tpu.memory_space<vmem>>) attributes {dimension_semantics = [#tpu.dimension_semantics<parallel>], iteration_bounds = array<i64: 1>, scalar_prefetch = 0 : i64, scratch_operands = 0 : i64, tpu.core_type = #tpu.core_type<tc>, window_params = [{transform_indices = @transform_0, window_bounds = array<i64: 64, 2048>}, {transform_indices = @transform_1, window_bounds = array<i64: 64, 2048>}]} {
    %c0 = arith.constant 0 : index
    %c0_0 = arith.constant 0 : index
    %0 = vector.load %arg1[%c0, %c0_0] : memref<64x2048xf32, #tpu.memory_space<vmem>>, vector<64x2048xf32>
    %cst = arith.constant 0.000000e+00 : f32
    %1 = vector.broadcast %cst : f32 to vector<64x2048xf32>
    %2 = arith.maximumf %0, %1 : vector<64x2048xf32>
    %cst_1 = arith.constant 6.000000e+00 : f32
    %3 = vector.broadcast %cst_1 : f32 to vector<64x2048xf32>
    %4 = arith.minimumf %2, %3 : vector<64x2048xf32>
    %c0_2 = arith.constant 0 : index
    %c0_3 = arith.constant 0 : index
    %5 = vector.load %arg2[%c0_2, %c0_3] : memref<64x2048xf32, #tpu.memory_space<vmem>>, vector<64x2048xf32>
    tpu.vector_store %arg2[%c0_2, %c0_3], %4 {strides = array<i32>} : memref<64x2048xf32, #tpu.memory_space<vmem>>, vector<64x2048xf32>,
    return
  }
  func.func @transform_0(%arg0: i32) -> (i32, i32) {
    %c0_i32 = arith.constant 0 : i32
    %c0_i32_0 = arith.constant 0 : i32
    return %arg0, %c0_i32 : i32, i32
  }
  func.func @transform_1(%arg0: i32) -> (i32, i32) {
    %c0_i32 = arith.constant 0 : i32
    %c0_i32_0 = arith.constant 0 : i32
    return %arg0, %c0_i32 : i32, i32
  }
}

</mosaic_0001>

<bundles_post_ra>
// kernel: tpu_custom_call.1
= control target key start
LH: loop header
LB: loop body
LE: loop exit
PB: predicated region body
PF: predicated region fallthrough
CT: control target
= control target key end

     0   :  { %6 = vsyncpa [#allocation3], 0  ;;  %s648_s0 = inlined_call_operand.hbm [shape: f32[64,2048], index: 0, kind: input, shape index: {}]   ;;  %s649_s1 = inlined_call_operand.hbm [shape: f32[64,2048], index: 1, kind: output, shape index: {}]  }
   0x1   :  { %7 = vsyncpa [#allocation4], 0  ;;  %s604_s6 = smov [#allocation2]   ;;  %s556_s10 = scalar_lea.hbm %s648_s0, 16384 }
   0x2   :  { %s13_s7 = sshll.u32 %s604_s6, 4  ;;  %p557_p0 = scmp.ne.s32.totalorder %s648_s0, %s556_s10  ;;  %s14_s7 = int_to_ptr.vmem [resolvable:$true] %s13_s7 }
   0x3   :  { %p560_p1 = scmp.lt.u32.totalorder %s556_s10, %s648_s0 }
   0x5   :  { %p562_p2 = pnand %p560_p1, %p557_p0 }
   0x7   :  { %565 = shalt.err (!%p562_p2)
}
   0x8   :  { %s566_s15 = scalar_lea.vmem %s14_s7, 16384  ;;  %p571_p4 = scmp.lt.s32.totalorder %s14_s7, %s14_s7 }
   0x9   :  { %p567_p3 = scmp.ne.s32.totalorder %s14_s7, %s566_s15  ;;  %p572_p5 = scmp.lt.s32.totalorder %s566_s15, %s566_s15 }
   0xb   :  { %p573_p6 = por %p572_p5, %p571_p4 }
   0xd   :  { %p574_p7 = pnand %p573_p6, %p567_p3 }
   0xf   :  { %577 = shalt.err (!%p574_p7)
}
  0x10   :  { %s605_s16 = smov 2048   ;;  %s606_s17 = smov 128  }
  0x11   :  { %19 = dma.hbm_to_vmem [thread:$0]  %s648_s0, 16384, %s14_s7, [#allocation3], %s605_s16, %s605_s16, %s606_s17  }
  0x12   :  { %600 = dma.done.wait [#allocation3], 16384  }
  0x13   :  { %601 = vsyncadd [#allocation3], 4294950912  ;;  %v23_v0 = vld [vmem:[#allocation2] sm:$0xff]  ;;  %v24_v1 = vld [vmem:[#allocation2 + $0x8] sm:$0xff]  ;;  %s607_s0 = smov [#allocation5]  }
  0x14   :  { %v25_v2 = vld [vmem:[#allocation2 + $0x10] sm:$0xff]  ;;  %v151_v3 = vmax.f32 %v23_v0, 0.0  ;;  %v152_v4 = vmax.f32 %v24_v1, 0.0  ;;  %v26_v6 = vld [vmem:[#allocation2 + $0x18] sm:$0xff]  ;;  %v27_v7 = vld [vmem:[#allocation2 + $0x20] sm:$0xff]  ;;  %s540_s20 = sshll.u32 %s607_s0, 4  ;;  %s541_s20 = int_to_ptr.vmem [resolvable:$true] %s540_s20 }
  0x15   :  { %v153_v5 = vmax.f32 %v25_v2, 0.0  ;;  %v28_v8 = vld [vmem:[#allocation2 + $0x28] sm:$0xff]  ;;  %v154_v9 = vmax.f32 %v26_v6, 0.0  ;;  %v155_v10 = vmax.f32 %v27_v7, 0.0  ;;  %v29_v12 = vld [vmem:[#allocation2 + $0x30] sm:$0xff]  ;;  %v30_v13 = vld [vmem:[#allocation2 + $0x38] sm:$0xff]  ;;  %p583_p9 = scmp.lt.s32.totalorder %s541_s20, %s541_s20 }
  0x16   :  { %v156_v11 = vmax.f32 %v28_v8, 0.0  ;;  %v31_v14 = vld [vmem:[#allocation2 + $0x40] sm:$0xff]  ;;  %v279_v15 = vmin.f32 %v151_v3, 6.0  ;;  %v280_v16 = vmin.f32 %v152_v4, 6.0  ;;  %v157_v18 = vmax.f32 %v29_v12, 0.0  ;;  %v32_v19 = vld [vmem:[#allocation2 + $0x48] sm:$0xff] }
  0x17   :  { %v281_v17 = vmin.f32 %v153_v5, 6.0  ;;  %v33_v20 = vld [vmem:[#allocation2 + $0x50] sm:$0xff]  ;;  %v282_v21 = vmin.f32 %v154_v9, 6.0  ;;  %v283_v22 = vmin.f32 %v155_v10, 6.0  ;;  %v158_v24 = vmax.f32 %v30_v13, 0.0  ;;  %v34_v25 = vld [vmem:[#allocation2 + $0x58] sm:$0xff] }
  0x18   :  { %v284_v23 = vmin.f32 %v156_v11, 6.0  ;;  %v35_v26 = vld [vmem:[#allocation2 + $0x60] sm:$0xff]  ;;  %407 = vst [vmem:[#allocation5] sm:$0xff] %v279_v15  ;;  %408 = vst [vmem:[#allocation5 + $0x8] sm:$0xff] %v280_v16  ;;  %v285_v27 = vmin.f32 %v157_v18, 6.0  ;;  %v159_v28 = vmax.f32 %v31_v14, 0.0 }
  0x19   :  { %409 = vst [vmem:[#allocation5 + $0x10] sm:$0xff] %v281_v17  ;;  %v160_v29 = vmax.f32 %v32_v19, 0.0  ;;  %v161_v30 = vmax.f32 %v33_v20, 0.0  ;;  %v36_v31 = vld [vmem:[#allocation2 + $0x68] sm:$0xff]  ;;  %v37_v32 = vld [vmem:[#allocation2 + $0x70] sm:$0xff]  ;;  %410 = vst [vmem:[#allocation5 + $0x18] sm:$0xff] %v282_v21 }
  0x1a   :  { %411 = vst [vmem:[#allocation5 + $0x20] sm:$0xff] %v283_v22  ;;  %412 = vst [vmem:[#allocation5 + $0x28] sm:$0xff] %v284_v23  ;;  %v286_v33 = vmin.f32 %v158_v24, 6.0  ;;  %v162_v34 = vmax.f32 %v34_v25, 0.0  ;;  %v163_v35 = vmax.f32 %v35_v26, 0.0  ;;  %v164_v36 = vmax.f32 %v36_v31, 0.0 }
  0x1b   :  { %v38_v37 = vld [vmem:[#allocation2 + $0x78] sm:$0xff]  ;;  %v39_v38 = vld [vmem:[#allocation2 + $0x80] sm:$0xff]  ;;  %413 = vst [vmem:[#allocation5 + $0x30] sm:$0xff] %v285_v27  ;;  %v287_v39 = vmin.f32 %v159_v28, 6.0  ;;  %v288_v40 = vmin.f32 %v160_v29, 6.0  ;;  %v289_v41 = vmin.f32 %v161_v30, 6.0 }
  0x1c   :  { %v165_v42 = vmax.f32 %v37_v32, 0.0  ;;  %v40_v43 = vld [vmem:[#allocation2 + $0x88] sm:$0xff]  ;;  %v41_v44 = vld [vmem:[#allocation2 + $0x90] sm:$0xff]  ;;  %414 = vst [vmem:[#allocation5 + $0x38] sm:$0xff] %v286_v33  ;;  %v290_v45 = vmin.f32 %v162_v34, 6.0  ;;  %v291_v46 = vmin.f32 %v163_v35, 6.0 }
  0x1d   :  { %v292_v47 = vmin.f32 %v164_v36, 6.0  ;;  %v166_v48 = vmax.f32 %v38_v37, 0.0  ;;  %v42_v49 = vld [vmem:[#allocation2 + $0x98] sm:$0xff]  ;;  %v43_v50 = vld [vmem:[#allocation2 + $0xa0] sm:$0xff]  ;;  %415 = vst [vmem:[#allocation5 + $0x40] sm:$0xff] %v287_v39  ;;  %416 = vst [vmem:[#allocation5 + $0x48] sm:$0xff] %v288_v40 }
  0x1e   :  { %417 = vst [vmem:[#allocation5 + $0x50] sm:$0xff] %v289_v41  ;;  %v293_v51 = vmin.f32 %v165_v42, 6.0  ;;  %v167_v52 = vmax.f32 %v39_v38, 0.0  ;;  %v168_v53 = vmax.f32 %v40_v43, 0.0  ;;  %v169_v54 = vmax.f32 %v41_v44, 0.0  ;;  %v44_v55 = vld [vmem:[#allocation2 + $0xa8] sm:$0xff] }
  0x1f   :  { %v45_v56 = vld [vmem:[#allocation2 + $0xb0] sm:$0xff]  ;;  %418 = vst [vmem:[#allocation5 + $0x58] sm:$0xff] %v290_v45  ;;  %419 = vst [vmem:[#allocation5 + $0x60] sm:$0xff] %v291_v46  ;;  %v294_v57 = vmin.f32 %v166_v48, 6.0  ;;  %v170_v58 = vmax.f32 %v42_v49, 0.0  ;;  %v171_v59 = vmax.f32 %v43_v50, 0.0 }
  0x20   :  { %420 = vst [vmem:[#allocation5 + $0x68] sm:$0xff] %v292_v47  ;;  %v172_v60 = vmax.f32 %v44_v55, 0.0  ;;  %v46_v61 = vld [vmem:[#allocation2 + $0xb8] sm:$0xff]  ;;  %v47_v62 = vld [vmem:[#allocation2 + $0xc0] sm:$0xff]  ;;  %421 = vst [vmem:[#allocation5 + $0x70] sm:$0xff] %v293_v51  ;;  %v295_v63 = vmin.f32 %v167_v52, 6.0 }
  0x21   :  { %v296_v0 = vmin.f32 %v168_v53, 6.0  ;;  %v297_v1 = vmin.f32 %v169_v54, 6.0  ;;  %v173_v2 = vmax.f32 %v45_v56, 0.0  ;;  %v48_v3 = vld [vmem:[#allocation2 + $0xc8] sm:$0xff]  ;;  %v49_v4 = vld [vmem:[#allocation2 + $0xd0] sm:$0xff]  ;;  %422 = vst [vmem:[#allocation5 + $0x78] sm:$0xff] %v294_v57 }
  0x22   :  { %v298_v5 = vmin.f32 %v170_v58, 6.0  ;;  %v299_v6 = vmin.f32 %v171_v59, 6.0  ;;  %v300_v7 = vmin.f32 %v172_v60, 6.0  ;;  %v174_v8 = vmax.f32 %v46_v61, 0.0  ;;  %v50_v9 = vld [vmem:[#allocation2 + $0xd8] sm:$0xff]  ;;  %v51_v10 = vld [vmem:[#allocation2 + $0xe0] sm:$0xff] }
  0x23   :  { %423 = vst [vmem:[#allocation5 + $0x80] sm:$0xff] %v295_v63  ;;  %424 = vst [vmem:[#allocation5 + $0x88] sm:$0xff] %v296_v0  ;;  %v301_v11 = vmin.f32 %v173_v2, 6.0  ;;  %v175_v12 = vmax.f32 %v47_v62, 0.0  ;;  %v176_v13 = vmax.f32 %v48_v3, 0.0  ;;  %v177_v14 = vmax.f32 %v49_v4, 0.0 }
  0x24   :  { %425 = vst [vmem:[#allocation5 + $0x90] sm:$0xff] %v297_v1  ;;  %v52_v15 = vld [vmem:[#allocation2 + $0xe8] sm:$0xff]  ;;  %v53_v16 = vld [vmem:[#allocation2 + $0xf0] sm:$0xff]  ;;  %426 = vst [vmem:[#allocation5 + $0x98] sm:$0xff] %v298_v5  ;;  %v302_v17 = vmin.f32 %v174_v8, 6.0  ;;  %v178_v18 = vmax.f32 %v50_v9, 0.0 }
  0x25   :  { %427 = vst [vmem:[#allocation5 + $0xa0] sm:$0xff] %v299_v6  ;;  %428 = vst [vmem:[#allocation5 + $0xa8] sm:$0xff] %v300_v7  ;;  %v179_v19 = vmax.f32 %v51_v10, 0.0  ;;  %v180_v20 = vmax.f32 %v52_v15, 0.0  ;;  %v54_v21 = vld [vmem:[#allocation2 + $0xf8] sm:$0xff]  ;;  %v55_v22 = vld [vmem:[#allocation2 + $0x100] sm:$0xff] }
  0x26   :  { %429 = vst [vmem:[#allocation5 + $0xb0] sm:$0xff] %v301_v11  ;;  %v303_v23 = vmin.f32 %v175_v12, 6.0  ;;  %v304_v24 = vmin.f32 %v176_v13, 6.0  ;;  %v305_v25 = vmin.f32 %v177_v14, 6.0  ;;  %v181_v26 = vmax.f32 %v53_v16, 0.0  ;;  %v56_v27 = vld [vmem:[#allocation2 + $0x108] sm:$0xff] }
  0x27   :  { %v57_v28 = vld [vmem:[#allocation2 + $0x110] sm:$0xff]  ;;  %430 = vst [vmem:[#allocation5 + $0xb8] sm:$0xff] %v302_v17  ;;  %v306_v29 = vmin.f32 %v178_v18, 6.0  ;;  %v307_v30 = vmin.f32 %v179_v19, 6.0  ;;  %v308_v31 = vmin.f32 %v180_v20, 6.0  ;;  %v182_v32 = vmax.f32 %v54_v21, 0.0 }
  0x28   :  { %v58_v33 = vld [vmem:[#allocation2 + $0x118] sm:$0xff]  ;;  %v59_v34 = vld [vmem:[#allocation2 + $0x120] sm:$0xff]  ;;  %431 = vst [vmem:[#allocation5 + $0xc0] sm:$0xff] %v303_v23  ;;  %432 = vst [vmem:[#allocation5 + $0xc8] sm:$0xff] %v304_v24  ;;  %v309_v35 = vmin.f32 %v181_v26, 6.0  ;;  %v183_v36 = vmax.f32 %v55_v22, 0.0 }
  0x29   :  { %433 = vst [vmem:[#allocation5 + $0xd0] sm:$0xff] %v305_v25  ;;  %v184_v37 = vmax.f32 %v56_v27, 0.0  ;;  %v185_v38 = vmax.f32 %v57_v28, 0.0  ;;  %v60_v39 = vld [vmem:[#allocation2 + $0x128] sm:$0xff]  ;;  %v61_v40 = vld [vmem:[#allocation2 + $0x130] sm:$0xff]  ;;  %434 = vst [vmem:[#allocation5 + $0xd8] sm:$0xff] %v306_v29 }
  0x2a   :  { %435 = vst [vmem:[#allocation5 + $0xe0] sm:$0xff] %v307_v30  ;;  %436 = vst [vmem:[#allocation5 + $0xe8] sm:$0xff] %v308_v31  ;;  %v310_v41 = vmin.f32 %v182_v32, 6.0  ;;  %v186_v42 = vmax.f32 %v58_v33, 0.0  ;;  %v187_v43 = vmax.f32 %v59_v34, 0.0  ;;  %v188_v44 = vmax.f32 %v60_v39, 0.0 }
  0x2b   :  { %v62_v45 = vld [vmem:[#allocation2 + $0x138] sm:$0xff]  ;;  %v63_v46 = vld [vmem:[#allocation2 + $0x140] sm:$0xff]  ;;  %437 = vst [vmem:[#allocation5 + $0xf0] sm:$0xff] %v309_v35  ;;  %v311_v47 = vmin.f32 %v183_v36, 6.0  ;;  %v312_v48 = vmin.f32 %v184_v37, 6.0  ;;  %v313_v49 = vmin.f32 %v185_v38, 6.0 }
  0x2c   :  { %v189_v50 = vmax.f32 %v61_v40, 0.0  ;;  %v64_v51 = vld [vmem:[#allocation2 + $0x148] sm:$0xff]  ;;  %v65_v52 = vld [vmem:[#allocation2 + $0x150] sm:$0xff]  ;;  %438 = vst [vmem:[#allocation5 + $0xf8] sm:$0xff] %v310_v41  ;;  %v314_v53 = vmin.f32 %v186_v42, 6.0  ;;  %v315_v54 = vmin.f32 %v187_v43, 6.0 }
  0x2d   :  { %v316_v55 = vmin.f32 %v188_v44, 6.0  ;;  %v190_v56 = vmax.f32 %v62_v45, 0.0  ;;  %v66_v57 = vld [vmem:[#allocation2 + $0x158] sm:$0xff]  ;;  %v67_v58 = vld [vmem:[#allocation2 + $0x160] sm:$0xff]  ;;  %439 = vst [vmem:[#allocation5 + $0x100] sm:$0xff] %v311_v47  ;;  %440 = vst [vmem:[#allocation5 + $0x108] sm:$0xff] %v312_v48 }
  0x2e   :  { %441 = vst [vmem:[#allocation5 + $0x110] sm:$0xff] %v313_v49  ;;  %v317_v59 = vmin.f32 %v189_v50, 6.0  ;;  %v191_v60 = vmax.f32 %v63_v46, 0.0  ;;  %v192_v61 = vmax.f32 %v64_v51, 0.0  ;;  %v193_v62 = vmax.f32 %v65_v52, 0.0  ;;  %v68_v63 = vld [vmem:[#allocation2 + $0x168] sm:$0xff] }
  0x2f   :  { %v69_v0 = vld [vmem:[#allocation2 + $0x170] sm:$0xff]  ;;  %442 = vst [vmem:[#allocation5 + $0x118] sm:$0xff] %v314_v53  ;;  %443 = vst [vmem:[#allocation5 + $0x120] sm:$0xff] %v315_v54  ;;  %v318_v1 = vmin.f32 %v190_v56, 6.0  ;;  %v194_v2 = vmax.f32 %v66_v57, 0.0  ;;  %v195_v3 = vmax.f32 %v67_v58, 0.0 }
  0x30   :  { %444 = vst [vmem:[#allocation5 + $0x128] sm:$0xff] %v316_v55  ;;  %v196_v4 = vmax.f32 %v68_v63, 0.0  ;;  %v70_v5 = vld [vmem:[#allocation2 + $0x178] sm:$0xff]  ;;  %v71_v6 = vld [vmem:[#allocation2 + $0x180] sm:$0xff]  ;;  %445 = vst [vmem:[#allocation5 + $0x130] sm:$0xff] %v317_v59  ;;  %v319_v7 = vmin.f32 %v191_v60, 6.0 }
  0x31   :  { %v320_v8 = vmin.f32 %v192_v61, 6.0  ;;  %v321_v9 = vmin.f32 %v193_v62, 6.0  ;;  %v197_v10 = vmax.f32 %v69_v0, 0.0  ;;  %v72_v11 = vld [vmem:[#allocation2 + $0x188] sm:$0xff]  ;;  %v73_v12 = vld [vmem:[#allocation2 + $0x190] sm:$0xff]  ;;  %446 = vst [vmem:[#allocation5 + $0x138] sm:$0xff] %v318_v1 }
  0x32   :  { %v322_v13 = vmin.f32 %v194_v2, 6.0  ;;  %v323_v14 = vmin.f32 %v195_v3, 6.0  ;;  %v324_v15 = vmin.f32 %v196_v4, 6.0  ;;  %v198_v16 = vmax.f32 %v70_v5, 0.0  ;;  %v74_v17 = vld [vmem:[#allocation2 + $0x198] sm:$0xff]  ;;  %v75_v18 = vld [vmem:[#allocation2 + $0x1a0] sm:$0xff] }
  0x33   :  { %447 = vst [vmem:[#allocation5 + $0x140] sm:$0xff] %v319_v7  ;;  %448 = vst [vmem:[#allocation5 + $0x148] sm:$0xff] %v320_v8  ;;  %v325_v19 = vmin.f32 %v197_v10, 6.0  ;;  %v199_v20 = vmax.f32 %v71_v6, 0.0  ;;  %v200_v21 = vmax.f32 %v72_v11, 0.0  ;;  %v201_v22 = vmax.f32 %v73_v12, 0.0 }
  0x34   :  { %449 = vst [vmem:[#allocation5 + $0x150] sm:$0xff] %v321_v9  ;;  %v76_v23 = vld [vmem:[#allocation2 + $0x1a8] sm:$0xff]  ;;  %v77_v24 = vld [vmem:[#allocation2 + $0x1b0] sm:$0xff]  ;;  %450 = vst [vmem:[#allocation5 + $0x158] sm:$0xff] %v322_v13  ;;  %v326_v25 = vmin.f32 %v198_v16, 6.0  ;;  %v202_v26 = vmax.f32 %v74_v17, 0.0 }
  0x35   :  { %451 = vst [vmem:[#allocation5 + $0x160] sm:$0xff] %v323_v14  ;;  %452 = vst [vmem:[#allocation5 + $0x168] sm:$0xff] %v324_v15  ;;  %v203_v27 = vmax.f32 %v75_v18, 0.0  ;;  %v204_v28 = vmax.f32 %v76_v23, 0.0  ;;  %v78_v29 = vld [vmem:[#allocation2 + $0x1b8] sm:$0xff]  ;;  %v79_v30 = vld [vmem:[#allocation2 + $0x1c0] sm:$0xff] }
  0x36   :  { %453 = vst [vmem:[#allocation5 + $0x170] sm:$0xff] %v325_v19  ;;  %v327_v31 = vmin.f32 %v199_v20, 6.0  ;;  %v328_v32 = vmin.f32 %v200_v21, 6.0  ;;  %v329_v33 = vmin.f32 %v201_v22, 6.0  ;;  %v205_v34 = vmax.f32 %v77_v24, 0.0  ;;  %v80_v35 = vld [vmem:[#allocation2 + $0x1c8] sm:$0xff] }
  0x37   :  { %v81_v36 = vld [vmem:[#allocation2 + $0x1d0] sm:$0xff]  ;;  %454 = vst [vmem:[#allocation5 + $0x178] sm:$0xff] %v326_v25  ;;  %v330_v37 = vmin.f32 %v202_v26, 6.0  ;;  %v331_v38 = vmin.f32 %v203_v27, 6.0  ;;  %v332_v39 = vmin.f32 %v204_v28, 6.0  ;;  %v206_v40 = vmax.f32 %v78_v29, 0.0 }
  0x38   :  { %v82_v41 = vld [vmem:[#allocation2 + $0x1d8] sm:$0xff]  ;;  %v83_v42 = vld [vmem:[#allocation2 + $0x1e0] sm:$0xff]  ;;  %455 = vst [vmem:[#allocation5 + $0x180] sm:$0xff] %v327_v31  ;;  %456 = vst [vmem:[#allocation5 + $0x188] sm:$0xff] %v328_v32  ;;  %v333_v43 = vmin.f32 %v205_v34, 6.0  ;;  %v207_v44 = vmax.f32 %v79_v30, 0.0 }
  0x39   :  { %457 = vst [vmem:[#allocation5 + $0x190] sm:$0xff] %v329_v33  ;;  %v208_v45 = vmax.f32 %v80_v35, 0.0  ;;  %v209_v46 = vmax.f32 %v81_v36, 0.0  ;;  %v84_v47 = vld [vmem:[#allocation2 + $0x1e8] sm:$0xff]  ;;  %v85_v48 = vld [vmem:[#allocation2 + $0x1f0] sm:$0xff]  ;;  %458 = vst [vmem:[#allocation5 + $0x198] sm:$0xff] %v330_v37 }
  0x3a   :  { %459 = vst [vmem:[#allocation5 + $0x1a0] sm:$0xff] %v331_v38  ;;  %460 = vst [vmem:[#allocation5 + $0x1a8] sm:$0xff] %v332_v39  ;;  %v334_v49 = vmin.f32 %v206_v40, 6.0  ;;  %v210_v50 = vmax.f32 %v82_v41, 0.0  ;;  %v211_v51 = vmax.f32 %v83_v42, 0.0  ;;  %v212_v52 = vmax.f32 %v84_v47, 0.0 }
  0x3b   :  { %v86_v53 = vld [vmem:[#allocation2 + $0x1f8] sm:$0xff]  ;;  %v87_v54 = vld [vmem:[#allocation2 + $0x200] sm:$0xff]  ;;  %461 = vst [vmem:[#allocation5 + $0x1b0] sm:$0xff] %v333_v43  ;;  %v335_v55 = vmin.f32 %v207_v44, 6.0  ;;  %v336_v56 = vmin.f32 %v208_v45, 6.0  ;;  %v337_v57 = vmin.f32 %v209_v46, 6.0 }
  0x3c   :  { %v213_v58 = vmax.f32 %v85_v48, 0.0  ;;  %v88_v59 = vld [vmem:[#allocation2 + $0x208] sm:$0xff]  ;;  %v89_v60 = vld [vmem:[#allocation2 + $0x210] sm:$0xff]  ;;  %462 = vst [vmem:[#allocation5 + $0x1b8] sm:$0xff] %v334_v49  ;;  %v338_v61 = vmin.f32 %v210_v50, 6.0  ;;  %v339_v62 = vmin.f32 %v211_v51, 6.0 }
  0x3d   :  { %v340_v63 = vmin.f32 %v212_v52, 6.0  ;;  %v214_v0 = vmax.f32 %v86_v53, 0.0  ;;  %v90_v1 = vld [vmem:[#allocation2 + $0x218] sm:$0xff]  ;;  %v91_v2 = vld [vmem:[#allocation2 + $0x220] sm:$0xff]  ;;  %463 = vst [vmem:[#allocation5 + $0x1c0] sm:$0xff] %v335_v55  ;;  %464 = vst [vmem:[#allocation5 + $0x1c8] sm:$0xff] %v336_v56 }
  0x3e   :  { %465 = vst [vmem:[#allocation5 + $0x1d0] sm:$0xff] %v337_v57  ;;  %v341_v3 = vmin.f32 %v213_v58, 6.0  ;;  %v215_v4 = vmax.f32 %v87_v54, 0.0  ;;  %v216_v5 = vmax.f32 %v88_v59, 0.0  ;;  %v217_v6 = vmax.f32 %v89_v60, 0.0  ;;  %v92_v7 = vld [vmem:[#allocation2 + $0x228] sm:$0xff] }
  0x3f   :  { %v93_v8 = vld [vmem:[#allocation2 + $0x230] sm:$0xff]  ;;  %466 = vst [vmem:[#allocation5 + $0x1d8] sm:$0xff] %v338_v61  ;;  %467 = vst [vmem:[#allocation5 + $0x1e0] sm:$0xff] %v339_v62  ;;  %v342_v9 = vmin.f32 %v214_v0, 6.0  ;;  %v218_v10 = vmax.f32 %v90_v1, 0.0  ;;  %v219_v11 = vmax.f32 %v91_v2, 0.0 }
  0x40   :  { %468 = vst [vmem:[#allocation5 + $0x1e8] sm:$0xff] %v340_v63  ;;  %v220_v12 = vmax.f32 %v92_v7, 0.0  ;;  %v94_v13 = vld [vmem:[#allocation2 + $0x238] sm:$0xff]  ;;  %v95_v14 = vld [vmem:[#allocation2 + $0x240] sm:$0xff]  ;;  %469 = vst [vmem:[#allocation5 + $0x1f0] sm:$0xff] %v341_v3  ;;  %v343_v15 = vmin.f32 %v215_v4, 6.0 }
  0x41   :  { %v344_v16 = vmin.f32 %v216_v5, 6.0  ;;  %v345_v17 = vmin.f32 %v217_v6, 6.0  ;;  %v221_v18 = vmax.f32 %v93_v8, 0.0  ;;  %v96_v19 = vld [vmem:[#allocation2 + $0x248] sm:$0xff]  ;;  %v97_v20 = vld [vmem:[#allocation2 + $0x250] sm:$0xff]  ;;  %470 = vst [vmem:[#allocation5 + $0x1f8] sm:$0xff] %v342_v9 }
  0x42   :  { %v346_v21 = vmin.f32 %v218_v10, 6.0  ;;  %v347_v22 = vmin.f32 %v219_v11, 6.0  ;;  %v348_v23 = vmin.f32 %v220_v12, 6.0  ;;  %v222_v24 = vmax.f32 %v94_v13, 0.0  ;;  %v98_v25 = vld [vmem:[#allocation2 + $0x258] sm:$0xff]  ;;  %v99_v26 = vld [vmem:[#allocation2 + $0x260] sm:$0xff] }
  0x43   :  { %471 = vst [vmem:[#allocation5 + $0x200] sm:$0xff] %v343_v15  ;;  %472 = vst [vmem:[#allocation5 + $0x208] sm:$0xff] %v344_v16  ;;  %v349_v27 = vmin.f32 %v221_v18, 6.0  ;;  %v223_v28 = vmax.f32 %v95_v14, 0.0  ;;  %v224_v29 = vmax.f32 %v96_v19, 0.0  ;;  %v225_v30 = vmax.f32 %v97_v20, 0.0 }
  0x44   :  { %473 = vst [vmem:[#allocation5 + $0x210] sm:$0xff] %v345_v17  ;;  %v100_v31 = vld [vmem:[#allocation2 + $0x268] sm:$0xff]  ;;  %v101_v32 = vld [vmem:[#allocation2 + $0x270] sm:$0xff]  ;;  %474 = vst [vmem:[#allocation5 + $0x218] sm:$0xff] %v346_v21  ;;  %v350_v33 = vmin.f32 %v222_v24, 6.0  ;;  %v226_v34 = vmax.f32 %v98_v25, 0.0 }
  0x45   :  { %475 = vst [vmem:[#allocation5 + $0x220] sm:$0xff] %v347_v22  ;;  %476 = vst [vmem:[#allocation5 + $0x228] sm:$0xff] %v348_v23  ;;  %v227_v35 = vmax.f32 %v99_v26, 0.0  ;;  %v228_v36 = vmax.f32 %v100_v31, 0.0  ;;  %v102_v37 = vld [vmem:[#allocation2 + $0x278] sm:$0xff]  ;;  %v103_v38 = vld [vmem:[#allocation2 + $0x280] sm:$0xff] }
  0x46   :  { %477 = vst [vmem:[#allocation5 + $0x230] sm:$0xff] %v349_v27  ;;  %v351_v39 = vmin.f32 %v223_v28, 6.0  ;;  %v352_v40 = vmin.f32 %v224_v29, 6.0  ;;  %v353_v41 = vmin.f32 %v225_v30, 6.0  ;;  %v229_v42 = vmax.f32 %v101_v32, 0.0  ;;  %v104_v43 = vld [vmem:[#allocation2 + $0x288] sm:$0xff] }
  0x47   :  { %v105_v44 = vld [vmem:[#allocation2 + $0x290] sm:$0xff]  ;;  %478 = vst [vmem:[#allocation5 + $0x238] sm:$0xff] %v350_v33  ;;  %v354_v45 = vmin.f32 %v226_v34, 6.0  ;;  %v355_v46 = vmin.f32 %v227_v35, 6.0  ;;  %v356_v47 = vmin.f32 %v228_v36, 6.0  ;;  %v230_v48 = vmax.f32 %v102_v37, 0.0 }
  0x48   :  { %v106_v49 = vld [vmem:[#allocation2 + $0x298] sm:$0xff]  ;;  %v107_v50 = vld [vmem:[#allocation2 + $0x2a0] sm:$0xff]  ;;  %479 = vst [vmem:[#allocation5 + $0x240] sm:$0xff] %v351_v39  ;;  %480 = vst [vmem:[#allocation5 + $0x248] sm:$0xff] %v352_v40  ;;  %v357_v51 = vmin.f32 %v229_v42, 6.0  ;;  %v231_v52 = vmax.f32 %v103_v38, 0.0 }
  0x49   :  { %481 = vst [vmem:[#allocation5 + $0x250] sm:$0xff] %v353_v41  ;;  %v232_v53 = vmax.f32 %v104_v43, 0.0  ;;  %v233_v54 = vmax.f32 %v105_v44, 0.0  ;;  %v108_v55 = vld [vmem:[#allocation2 + $0x2a8] sm:$0xff]  ;;  %v109_v56 = vld [vmem:[#allocation2 + $0x2b0] sm:$0xff]  ;;  %482 = vst [vmem:[#allocation5 + $0x258] sm:$0xff] %v354_v45 }
  0x4a   :  { %483 = vst [vmem:[#allocation5 + $0x260] sm:$0xff] %v355_v46  ;;  %484 = vst [vmem:[#allocation5 + $0x268] sm:$0xff] %v356_v47  ;;  %v358_v57 = vmin.f32 %v230_v48, 6.0  ;;  %v234_v58 = vmax.f32 %v106_v49, 0.0  ;;  %v235_v59 = vmax.f32 %v107_v50, 0.0  ;;  %v236_v60 = vmax.f32 %v108_v55, 0.0 }
  0x4b   :  { %v110_v61 = vld [vmem:[#allocation2 + $0x2b8] sm:$0xff]  ;;  %v111_v62 = vld [vmem:[#allocation2 + $0x2c0] sm:$0xff]  ;;  %485 = vst [vmem:[#allocation5 + $0x270] sm:$0xff] %v357_v51  ;;  %v359_v63 = vmin.f32 %v231_v52, 6.0  ;;  %v360_v0 = vmin.f32 %v232_v53, 6.0  ;;  %v361_v1 = vmin.f32 %v233_v54, 6.0 }
  0x4c   :  { %v237_v2 = vmax.f32 %v109_v56, 0.0  ;;  %v112_v3 = vld [vmem:[#allocation2 + $0x2c8] sm:$0xff]  ;;  %v113_v4 = vld [vmem:[#allocation2 + $0x2d0] sm:$0xff]  ;;  %486 = vst [vmem:[#allocation5 + $0x278] sm:$0xff] %v358_v57  ;;  %v362_v5 = vmin.f32 %v234_v58, 6.0  ;;  %v363_v6 = vmin.f32 %v235_v59, 6.0 }
  0x4d   :  { %v364_v7 = vmin.f32 %v236_v60, 6.0  ;;  %v238_v8 = vmax.f32 %v110_v61, 0.0  ;;  %v114_v9 = vld [vmem:[#allocation2 + $0x2d8] sm:$0xff]  ;;  %v115_v10 = vld [vmem:[#allocation2 + $0x2e0] sm:$0xff]  ;;  %487 = vst [vmem:[#allocation5 + $0x280] sm:$0xff] %v359_v63  ;;  %488 = vst [vmem:[#allocation5 + $0x288] sm:$0xff] %v360_v0 }
  0x4e   :  { %489 = vst [vmem:[#allocation5 + $0x290] sm:$0xff] %v361_v1  ;;  %v365_v11 = vmin.f32 %v237_v2, 6.0  ;;  %v239_v12 = vmax.f32 %v111_v62, 0.0  ;;  %v240_v13 = vmax.f32 %v112_v3, 0.0  ;;  %v241_v14 = vmax.f32 %v113_v4, 0.0  ;;  %v116_v15 = vld [vmem:[#allocation2 + $0x2e8] sm:$0xff] }
  0x4f   :  { %v117_v16 = vld [vmem:[#allocation2 + $0x2f0] sm:$0xff]  ;;  %490 = vst [vmem:[#allocation5 + $0x298] sm:$0xff] %v362_v5  ;;  %491 = vst [vmem:[#allocation5 + $0x2a0] sm:$0xff] %v363_v6  ;;  %v366_v17 = vmin.f32 %v238_v8, 6.0  ;;  %v242_v18 = vmax.f32 %v114_v9, 0.0  ;;  %v243_v19 = vmax.f32 %v115_v10, 0.0 }
  0x50   :  { %492 = vst [vmem:[#allocation5 + $0x2a8] sm:$0xff] %v364_v7  ;;  %v244_v20 = vmax.f32 %v116_v15, 0.0  ;;  %v118_v21 = vld [vmem:[#allocation2 + $0x2f8] sm:$0xff]  ;;  %v119_v22 = vld [vmem:[#allocation2 + $0x300] sm:$0xff]  ;;  %493 = vst [vmem:[#allocation5 + $0x2b0] sm:$0xff] %v365_v11  ;;  %v367_v23 = vmin.f32 %v239_v12, 6.0 }
  0x51   :  { %v368_v24 = vmin.f32 %v240_v13, 6.0  ;;  %v369_v25 = vmin.f32 %v241_v14, 6.0  ;;  %v245_v26 = vmax.f32 %v117_v16, 0.0  ;;  %v120_v27 = vld [vmem:[#allocation2 + $0x308] sm:$0xff]  ;;  %v121_v28 = vld [vmem:[#allocation2 + $0x310] sm:$0xff]  ;;  %494 = vst [vmem:[#allocation5 + $0x2b8] sm:$0xff] %v366_v17 }
  0x52   :  { %v370_v29 = vmin.f32 %v242_v18, 6.0  ;;  %v371_v30 = vmin.f32 %v243_v19, 6.0  ;;  %v372_v31 = vmin.f32 %v244_v20, 6.0  ;;  %v246_v32 = vmax.f32 %v118_v21, 0.0  ;;  %v122_v33 = vld [vmem:[#allocation2 + $0x318] sm:$0xff]  ;;  %v123_v34 = vld [vmem:[#allocation2 + $0x320] sm:$0xff] }
  0x53   :  { %495 = vst [vmem:[#allocation5 + $0x2c0] sm:$0xff] %v367_v23  ;;  %496 = vst [vmem:[#allocation5 + $0x2c8] sm:$0xff] %v368_v24  ;;  %v373_v35 = vmin.f32 %v245_v26, 6.0  ;;  %v247_v36 = vmax.f32 %v119_v22, 0.0  ;;  %v248_v37 = vmax.f32 %v120_v27, 0.0  ;;  %v249_v38 = vmax.f32 %v121_v28, 0.0 }
  0x54   :  { %497 = vst [vmem:[#allocation5 + $0x2d0] sm:$0xff] %v369_v25  ;;  %v124_v39 = vld [vmem:[#allocation2 + $0x328] sm:$0xff]  ;;  %v125_v40 = vld [vmem:[#allocation2 + $0x330] sm:$0xff]  ;;  %498 = vst [vmem:[#allocation5 + $0x2d8] sm:$0xff] %v370_v29  ;;  %v374_v41 = vmin.f32 %v246_v32, 6.0  ;;  %v250_v42 = vmax.f32 %v122_v33, 0.0 }
  0x55   :  { %499 = vst [vmem:[#allocation5 + $0x2e0] sm:$0xff] %v371_v30  ;;  %500 = vst [vmem:[#allocation5 + $0x2e8] sm:$0xff] %v372_v31  ;;  %v251_v43 = vmax.f32 %v123_v34, 0.0  ;;  %v252_v44 = vmax.f32 %v124_v39, 0.0  ;;  %v126_v45 = vld [vmem:[#allocation2 + $0x338] sm:$0xff]  ;;  %v127_v46 = vld [vmem:[#allocation2 + $0x340] sm:$0xff] }
  0x56   :  { %501 = vst [vmem:[#allocation5 + $0x2f0] sm:$0xff] %v373_v35  ;;  %v375_v47 = vmin.f32 %v247_v36, 6.0  ;;  %v376_v48 = vmin.f32 %v248_v37, 6.0  ;;  %v377_v49 = vmin.f32 %v249_v38, 6.0  ;;  %v253_v50 = vmax.f32 %v125_v40, 0.0  ;;  %v128_v51 = vld [vmem:[#allocation2 + $0x348] sm:$0xff] }
  0x57   :  { %v129_v52 = vld [vmem:[#allocation2 + $0x350] sm:$0xff]  ;;  %502 = vst [vmem:[#allocation5 + $0x2f8] sm:$0xff] %v374_v41  ;;  %v378_v53 = vmin.f32 %v250_v42, 6.0  ;;  %v379_v54 = vmin.f32 %v251_v43, 6.0  ;;  %v380_v55 = vmin.f32 %v252_v44, 6.0  ;;  %v254_v56 = vmax.f32 %v126_v45, 0.0 }
  0x58   :  { %v130_v57 = vld [vmem:[#allocation2 + $0x358] sm:$0xff]  ;;  %v131_v58 = vld [vmem:[#allocation2 + $0x360] sm:$0xff]  ;;  %503 = vst [vmem:[#allocation5 + $0x300] sm:$0xff] %v375_v47  ;;  %504 = vst [vmem:[#allocation5 + $0x308] sm:$0xff] %v376_v48  ;;  %v381_v59 = vmin.f32 %v253_v50, 6.0  ;;  %v255_v60 = vmax.f32 %v127_v46, 0.0 }
  0x59   :  { %505 = vst [vmem:[#allocation5 + $0x310] sm:$0xff] %v377_v49  ;;  %v256_v61 = vmax.f32 %v128_v51, 0.0  ;;  %v257_v62 = vmax.f32 %v129_v52, 0.0  ;;  %v132_v63 = vld [vmem:[#allocation2 + $0x368] sm:$0xff]  ;;  %v133_v0 = vld [vmem:[#allocation2 + $0x370] sm:$0xff]  ;;  %506 = vst [vmem:[#allocation5 + $0x318] sm:$0xff] %v378_v53 }
  0x5a   :  { %507 = vst [vmem:[#allocation5 + $0x320] sm:$0xff] %v379_v54  ;;  %508 = vst [vmem:[#allocation5 + $0x328] sm:$0xff] %v380_v55  ;;  %v382_v1 = vmin.f32 %v254_v56, 6.0  ;;  %v258_v2 = vmax.f32 %v130_v57, 0.0  ;;  %v259_v3 = vmax.f32 %v131_v58, 0.0  ;;  %v260_v4 = vmax.f32 %v132_v63, 0.0 }
  0x5b   :  { %v134_v5 = vld [vmem:[#allocation2 + $0x378] sm:$0xff]  ;;  %v135_v6 = vld [vmem:[#allocation2 + $0x380] sm:$0xff]  ;;  %509 = vst [vmem:[#allocation5 + $0x330] sm:$0xff] %v381_v59  ;;  %v383_v7 = vmin.f32 %v255_v60, 6.0  ;;  %v384_v8 = vmin.f32 %v256_v61, 6.0  ;;  %v385_v9 = vmin.f32 %v257_v62, 6.0 }
  0x5c   :  { %v261_v10 = vmax.f32 %v133_v0, 0.0  ;;  %v136_v11 = vld [vmem:[#allocation2 + $0x388] sm:$0xff]  ;;  %v137_v12 = vld [vmem:[#allocation2 + $0x390] sm:$0xff]  ;;  %510 = vst [vmem:[#allocation5 + $0x338] sm:$0xff] %v382_v1  ;;  %v386_v13 = vmin.f32 %v258_v2, 6.0  ;;  %v387_v14 = vmin.f32 %v259_v3, 6.0 }
  0x5d   :  { %v388_v15 = vmin.f32 %v260_v4, 6.0  ;;  %v262_v16 = vmax.f32 %v134_v5, 0.0  ;;  %v138_v17 = vld [vmem:[#allocation2 + $0x398] sm:$0xff]  ;;  %v139_v18 = vld [vmem:[#allocation2 + $0x3a0] sm:$0xff]  ;;  %511 = vst [vmem:[#allocation5 + $0x340] sm:$0xff] %v383_v7  ;;  %512 = vst [vmem:[#allocation5 + $0x348] sm:$0xff] %v384_v8 }
  0x5e   :  { %513 = vst [vmem:[#allocation5 + $0x350] sm:$0xff] %v385_v9  ;;  %v389_v19 = vmin.f32 %v261_v10, 6.0  ;;  %v263_v20 = vmax.f32 %v135_v6, 0.0  ;;  %v264_v21 = vmax.f32 %v136_v11, 0.0  ;;  %v265_v22 = vmax.f32 %v137_v12, 0.0  ;;  %v140_v23 = vld [vmem:[#allocation2 + $0x3a8] sm:$0xff] }
  0x5f   :  { %v141_v24 = vld [vmem:[#allocation2 + $0x3b0] sm:$0xff]  ;;  %514 = vst [vmem:[#allocation5 + $0x358] sm:$0xff] %v386_v13  ;;  %515 = vst [vmem:[#allocation5 + $0x360] sm:$0xff] %v387_v14  ;;  %v390_v25 = vmin.f32 %v262_v16, 6.0  ;;  %v266_v26 = vmax.f32 %v138_v17, 0.0  ;;  %v267_v27 = vmax.f32 %v139_v18, 0.0 }
  0x60   :  { %516 = vst [vmem:[#allocation5 + $0x368] sm:$0xff] %v388_v15  ;;  %v268_v28 = vmax.f32 %v140_v23, 0.0  ;;  %v142_v29 = vld [vmem:[#allocation2 + $0x3b8] sm:$0xff]  ;;  %v143_v30 = vld [vmem:[#allocation2 + $0x3c0] sm:$0xff]  ;;  %517 = vst [vmem:[#allocation5 + $0x370] sm:$0xff] %v389_v19  ;;  %v391_v31 = vmin.f32 %v263_v20, 6.0 }
  0x61   :  { %v392_v32 = vmin.f32 %v264_v21, 6.0  ;;  %v393_v33 = vmin.f32 %v265_v22, 6.0  ;;  %v269_v34 = vmax.f32 %v141_v24, 0.0  ;;  %v144_v35 = vld [vmem:[#allocation2 + $0x3c8] sm:$0xff]  ;;  %v145_v36 = vld [vmem:[#allocation2 + $0x3d0] sm:$0xff]  ;;  %518 = vst [vmem:[#allocation5 + $0x378] sm:$0xff] %v390_v25 }
  0x62   :  { %v394_v37 = vmin.f32 %v266_v26, 6.0  ;;  %v395_v38 = vmin.f32 %v267_v27, 6.0  ;;  %v396_v39 = vmin.f32 %v268_v28, 6.0  ;;  %v270_v40 = vmax.f32 %v142_v29, 0.0  ;;  %v146_v41 = vld [vmem:[#allocation2 + $0x3d8] sm:$0xff]  ;;  %v147_v42 = vld [vmem:[#allocation2 + $0x3e0] sm:$0xff] }
  0x63   :  { %519 = vst [vmem:[#allocation5 + $0x380] sm:$0xff] %v391_v31  ;;  %520 = vst [vmem:[#allocation5 + $0x388] sm:$0xff] %v392_v32  ;;  %v397_v43 = vmin.f32 %v269_v34, 6.0  ;;  %v271_v44 = vmax.f32 %v143_v30, 0.0  ;;  %v272_v45 = vmax.f32 %v144_v35, 0.0  ;;  %v273_v46 = vmax.f32 %v145_v36, 0.0 }
  0x64   :  { %521 = vst [vmem:[#allocation5 + $0x390] sm:$0xff] %v393_v33  ;;  %v148_v47 = vld [vmem:[#allocation2 + $0x3e8] sm:$0xff]  ;;  %v149_v48 = vld [vmem:[#allocation2 + $0x3f0] sm:$0xff]  ;;  %522 = vst [vmem:[#allocation5 + $0x398] sm:$0xff] %v394_v37  ;;  %v398_v49 = vmin.f32 %v270_v40, 6.0  ;;  %v274_v50 = vmax.f32 %v146_v41, 0.0 }
  0x65   :  { %523 = vst [vmem:[#allocation5 + $0x3a0] sm:$0xff] %v395_v38  ;;  %524 = vst [vmem:[#allocation5 + $0x3a8] sm:$0xff] %v396_v39  ;;  %v275_v51 = vmax.f32 %v147_v42, 0.0  ;;  %v276_v52 = vmax.f32 %v148_v47, 0.0  ;;  %v150_v53 = vld [vmem:[#allocation2 + $0x3f8] sm:$0xff]  ;;  %v399_v54 = vmin.f32 %v271_v44, 6.0 }
  0x66   :  { %525 = vst [vmem:[#allocation5 + $0x3b0] sm:$0xff] %v397_v43  ;;  %v400_v55 = vmin.f32 %v272_v45, 6.0  ;;  %v401_v56 = vmin.f32 %v273_v46, 6.0  ;;  %v277_v57 = vmax.f32 %v149_v48, 0.0  ;;  %526 = vst [vmem:[#allocation5 + $0x3b8] sm:$0xff] %v398_v49  ;;  %v402_v58 = vmin.f32 %v274_v50, 6.0 }
  0x67   :  { %v403_v59 = vmin.f32 %v275_v51, 6.0  ;;  %v404_v60 = vmin.f32 %v276_v52, 6.0  ;;  %v278_v61 = vmax.f32 %v150_v53, 0.0  ;;  %527 = vst [vmem:[#allocation5 + $0x3c0] sm:$0xff] %v399_v54  ;;  %s578_s21 = scalar_lea.vmem %s541_s20, 16384 }
  0x68   :  { %528 = vst [vmem:[#allocation5 + $0x3c8] sm:$0xff] %v400_v55  ;;  %529 = vst [vmem:[#allocation5 + $0x3d0] sm:$0xff] %v401_v56  ;;  %v405_v62 = vmin.f32 %v277_v57, 6.0  ;;  %p579_p8 = scmp.ne.s32.totalorder %s541_s20, %s578_s21  ;;  %p584_p10 = scmp.lt.s32.totalorder %s578_s21, %s578_s21 }
  0x69   :  { %530 = vst [vmem:[#allocation5 + $0x3d8] sm:$0xff] %v402_v58  ;;  %531 = vst [vmem:[#allocation5 + $0x3e0] sm:$0xff] %v403_v59  ;;  %v406_v63 = vmin.f32 %v278_v61, 6.0 }
  0x6a   :  { %532 = vst [vmem:[#allocation5 + $0x3e8] sm:$0xff] %v404_v60  ;;  %533 = vst [vmem:[#allocation5 + $0x3f0] sm:$0xff] %v405_v62  ;;  %p585_p11 = por %p584_p10, %p583_p9 }
  0x6b   :  { %534 = vst [vmem:[#allocation5 + $0x3f8] sm:$0xff] %v406_v63 }
  0x6c   :  { %p586_p12 = pnand %p585_p11, %p579_p8 }
  0x6e   :  { %589 = shalt.err (!%p586_p12)
}
  0x6f   :  { %s590_s24 = scalar_lea.hbm %s649_s1, 16384 }
  0x70   :  { %p591_p13 = scmp.ne.s32.totalorder %s649_s1, %s590_s24  ;;  %p594_p0 = scmp.lt.u32.totalorder %s590_s24, %s649_s1 }
  0x72   :  { %p596_p1 = pnand %p594_p0, %p591_p13 }
  0x74   :  { %599 = shalt.err (!%p596_p1)
}
  0x75   :  { %546 = dma.vmem_to_hbm [thread:$0]  %s541_s20, 16384, %s649_s1, [#allocation4], %s605_s16, %s605_s16, %s606_s17  }
  0x76   :  { %602 = dma.done.wait [#allocation4], 16384  }
  0x77   :  { %603 = vsyncadd [#allocation4], 4294950912 }
  0x78   :  { %550 = vsyncpa [#allocation3], 1 }
  0x79   :  { %551 = vsyncpa [#allocation4], 1 }

</bundles_post_ra>
